<compile_context>
chip_gen: v5e
topology: v5e:2x2
jax: 0.10.0
libtpu: 0.0.40
codegen_flags: <defaults>
</compile_context>

<pallas_src>
import functools

import jax
import jax.numpy as jnp
from jax.experimental import pallas as pl
from jax.experimental.pallas import tpu as pltpu


def _mlp_kernel(n_layers, in_dims, *refs):
    """Fused MLP kernel on one lane-major batch tile.

    refs = (x_ref, w0_ref, b0_ref, w1_ref, b1_ref, ..., o_ref)
      x_ref : (in_dim, tile_b)
      w_i   : (out_i, in_i)      (PyTorch nn.Linear layout)
      b_i   : (out_i, 1)
      o_ref : (out_dim, tile_b)
    """
    x_ref = refs[0]
    o_ref = refs[-1]
    h = x_ref[...].astype(jnp.float32)          # (in_dim, tile_b)
    for i in range(n_layers):
        w = refs[1 + 2 * i][...]                # (out_i, in_i)
        b = refs[2 + 2 * i][...]                # (out_i, 1)
        if in_dims[i] == 1:
            # K == 1: pure broadcast outer product on the VPU; keeps the MXU
            # (and its push/pop latency) out of the critical path.
            h = w * h + b                       # (out,1)*(1,B) -> (out,B)
        else:
            h = jnp.dot(w, h, preferred_element_type=jnp.float32) + b
        if i < n_layers - 1:                    # tanh on all but the last layer
            h = jnp.tanh(h)
    o_ref[...] = h.astype(o_ref.dtype)


def _choose_tile_b(batch):
    """Pick the batch (lane-dim) tile.

    Prefer large multiples of 256 (native MXU width on v6e/v7x, multiple of
    128 for v5e / lane density) while keeping >= 2 grid steps so both v7x
    TensorCores are used.  Tiny batches fall back to a single full-extent
    block (grid of 1), which is what the demo uses.
    """
    for cand in (2048, 1024, 512, 256, 128):
        if batch % cand == 0 and batch // cand >= 2:
            return cand
    return batch


def mlp_forward(x, weights, biases, *, tile_b=None):
    """Forward pass of Sequentialmodel as a single fused Pallas call.

    x:        (batch, layers[0])          f32
    weights:  list of (out_i, in_i)       f32   (PyTorch nn.Linear layout)
    biases:   list of (out_i, 1)          f32
    returns   (batch, layers[-1])         f32
    """
    n_layers = len(weights)
    batch, in_dim = x.shape
    out_dim = weights[-1].shape[0]
    in_dims = tuple(w.shape[1] for w in weights)

    if tile_b is None:
        tile_b = _choose_tile_b(batch)
    assert batch % tile_b == 0, "batch must be a multiple of tile_b"

    # Transpose so batch maps to the lane (fast, last) dimension.
    xt = x.T                                    # (in_dim, batch)

    # x is tiled along the batch (lane) dim; weights/biases use the same block
    # for every grid step, so they stay resident in VMEM.
    in_specs = [pl.BlockSpec((in_dim, tile_b), lambda i: (0, i))]
    params = []
    for w, b in zip(weights, biases):
        in_specs.append(pl.BlockSpec(w.shape, lambda i: (0, 0)))
        in_specs.append(pl.BlockSpec(b.shape, lambda i: (0, 0)))
        params.extend([w, b])

    out_specs = pl.BlockSpec((out_dim, tile_b), lambda i: (0, i))

    kernel = functools.partial(_mlp_kernel, n_layers, in_dims)

    out_t = pl.pallas_call(
        kernel,
        out_shape=jax.ShapeDtypeStruct((out_dim, batch), jnp.float32),
        grid=(batch // tile_b,),
        in_specs=in_specs,
        out_specs=out_specs,
        compiler_params=pltpu.CompilerParams(
            dimension_semantics=("parallel",),
        ),
    )(xt, *params)

    return out_t.T                              # (batch, out_dim)


def init_params(layers, key):
    """Xavier-normal weights (gain=1), zero biases, matching the torch init.

    Weights are kept in the PyTorch nn.Linear layout (out_features, in_features);
    biases as (out_features, 1) so they broadcast across the lane/batch dim.
    """
    weights, biases = [], []
    for i in range(len(layers) - 1):
        key, sub = jax.random.split(key)
        fan_in, fan_out = layers[i], layers[i + 1]
        std = (2.0 / (fan_in + fan_out)) ** 0.5
        w = std * jax.random.normal(sub, (fan_out, fan_in), dtype=jnp.float32)
        b = jnp.zeros((fan_out, 1), dtype=jnp.float32)
        weights.append(w)
        biases.append(b)
    return weights, biases


def reference_forward(x, weights, biases):
    """Pure-JAX reference of Sequentialmodel.forward."""
    h = x
    for i, (w, b) in enumerate(zip(weights, biases)):
        h = h @ w.T + b[:, 0]
        if i < len(weights) - 1:
            h = jnp.tanh(h)
    return h


if __name__ == "__main__":
    # Typical fPINN layer spec: 1-D coordinate in, scalar solution out.
    layers = [1, 32, 32, 32, 1]
    batch = 16

    key = jax.random.PRNGKey(0)
    key, xk = jax.random.split(key)
    x = jax.random.uniform(xk, (batch, layers[0]), dtype=jnp.float32,
                           minval=-1.0, maxval=1.0)

    weights, biases = init_params(layers, key)

    out = mlp_forward(x, weights, biases)
    out = jax.block_until_ready(out)

    ref = reference_forward(x, weights, biases)
    assert out.shape == (batch, layers[-1])
    assert jnp.allclose(out, ref, atol=1e-5, rtol=1e-5), (
        f"max abs err = {jnp.max(jnp.abs(out - ref))}")

    print("KERNEL_OK")
</pallas_src>

<mosaic_0001>
module attributes {stable_mosaic.version = 11 : i64} {
  func.func @_mlp_kernel(%arg0: i32, %arg1: memref<1x16xf32, #tpu.memory_space<vmem>>, %arg2: memref<32x1xf32, #tpu.memory_space<vmem>>, %arg3: memref<32x1xf32, #tpu.memory_space<vmem>>, %arg4: memref<32x32xf32, #tpu.memory_space<vmem>>, %arg5: memref<32x1xf32, #tpu.memory_space<vmem>>, %arg6: memref<32x32xf32, #tpu.memory_space<vmem>>, %arg7: memref<32x1xf32, #tpu.memory_space<vmem>>, %arg8: memref<1x32xf32, #tpu.memory_space<vmem>>, %arg9: memref<1x1xf32, #tpu.memory_space<vmem>>, %arg10: memref<1x16xf32, #tpu.memory_space<vmem>>) attributes {dimension_semantics = [#tpu.dimension_semantics<parallel>], iteration_bounds = array<i64: 1>, scalar_prefetch = 0 : i64, scratch_operands = 0 : i64, tpu.core_type = #tpu.core_type<tc>, window_params = [{transform_indices = @transform_0, window_bounds = array<i64: 1, 16>}, {pipeline_mode = #tpu.pipeline_mode<synchronous>, transform_indices = @transform_1, window_bounds = array<i64: 32, 1>}, {pipeline_mode = #tpu.pipeline_mode<synchronous>, transform_indices = @transform_2, window_bounds = array<i64: 32, 1>}, {pipeline_mode = #tpu.pipeline_mode<synchronous>, transform_indices = @transform_3, window_bounds = array<i64: 32, 32>}, {pipeline_mode = #tpu.pipeline_mode<synchronous>, transform_indices = @transform_4, window_bounds = array<i64: 32, 1>}, {pipeline_mode = #tpu.pipeline_mode<synchronous>, transform_indices = @transform_5, window_bounds = array<i64: 32, 32>}, {pipeline_mode = #tpu.pipeline_mode<synchronous>, transform_indices = @transform_6, window_bounds = array<i64: 32, 1>}, {pipeline_mode = #tpu.pipeline_mode<synchronous>, transform_indices = @transform_7, window_bounds = array<i64: 1, 32>}, {pipeline_mode = #tpu.pipeline_mode<synchronous>, transform_indices = @transform_8, window_bounds = array<i64: 1, 1>}, {transform_indices = @transform_9, window_bounds = array<i64: 1, 16>}]} {
    %c0 = arith.constant 0 : index
    %c0_0 = arith.constant 0 : index
    %0 = vector.load %arg1[%c0, %c0_0] : memref<1x16xf32, #tpu.memory_space<vmem>>, vector<1x16xf32>
    %c0_1 = arith.constant 0 : index
    %c0_2 = arith.constant 0 : index
    %1 = vector.load %arg2[%c0_1, %c0_2] : memref<32x1xf32, #tpu.memory_space<vmem>>, vector<32x1xf32>
    %c0_3 = arith.constant 0 : index
    %c0_4 = arith.constant 0 : index
    %2 = vector.load %arg3[%c0_3, %c0_4] : memref<32x1xf32, #tpu.memory_space<vmem>>, vector<32x1xf32>
    %3 = vector.broadcast %1 : vector<32x1xf32> to vector<32x16xf32>
    %4 = vector.broadcast %0 : vector<1x16xf32> to vector<32x16xf32>
    %5 = arith.mulf %3, %4 : vector<32x16xf32>
    %6 = vector.broadcast %2 : vector<32x1xf32> to vector<32x16xf32>
    %7 = arith.addf %5, %6 : vector<32x16xf32>
    %8 = math.tanh %7 : vector<32x16xf32>
    %c0_5 = arith.constant 0 : index
    %c0_6 = arith.constant 0 : index
    %9 = vector.load %arg4[%c0_5, %c0_6] : memref<32x32xf32, #tpu.memory_space<vmem>>, vector<32x32xf32>
    %c0_7 = arith.constant 0 : index
    %c0_8 = arith.constant 0 : index
    %10 = vector.load %arg5[%c0_7, %c0_8] : memref<32x1xf32, #tpu.memory_space<vmem>>, vector<32x1xf32>
    %cst = arith.constant dense<0.000000e+00> : vector<32x16xf32>
    %11 = tpu.matmul %9, %8, %cst {dimension_numbers = #tpu.dot_dimension_numbers<[1], [0], [0], [1], [0, 0, 1, 1], [], []>} : vector<32x32xf32>, vector<32x16xf32>, vector<32x16xf32> -> vector<32x16xf32>
    %12 = vector.broadcast %10 : vector<32x1xf32> to vector<32x16xf32>
    %13 = arith.addf %11, %12 : vector<32x16xf32>
    %14 = math.tanh %13 : vector<32x16xf32>
    %c0_9 = arith.constant 0 : index
    %c0_10 = arith.constant 0 : index
    %15 = vector.load %arg6[%c0_9, %c0_10] : memref<32x32xf32, #tpu.memory_space<vmem>>, vector<32x32xf32>
    %c0_11 = arith.constant 0 : index
    %c0_12 = arith.constant 0 : index
    %16 = vector.load %arg7[%c0_11, %c0_12] : memref<32x1xf32, #tpu.memory_space<vmem>>, vector<32x1xf32>
    %cst_13 = arith.constant dense<0.000000e+00> : vector<32x16xf32>
    %17 = tpu.matmul %15, %14, %cst_13 {dimension_numbers = #tpu.dot_dimension_numbers<[1], [0], [0], [1], [0, 0, 1, 1], [], []>} : vector<32x32xf32>, vector<32x16xf32>, vector<32x16xf32> -> vector<32x16xf32>
    %18 = vector.broadcast %16 : vector<32x1xf32> to vector<32x16xf32>
    %19 = arith.addf %17, %18 : vector<32x16xf32>
    %20 = math.tanh %19 : vector<32x16xf32>
    %c0_14 = arith.constant 0 : index
    %c0_15 = arith.constant 0 : index
    %21 = vector.load %arg8[%c0_14, %c0_15] : memref<1x32xf32, #tpu.memory_space<vmem>>, vector<1x32xf32>
    %c0_16 = arith.constant 0 : index
    %c0_17 = arith.constant 0 : index
    %22 = vector.load %arg9[%c0_16, %c0_17] : memref<1x1xf32, #tpu.memory_space<vmem>>, vector<1x1xf32>
    %cst_18 = arith.constant dense<0.000000e+00> : vector<1x16xf32>
    %23 = tpu.matmul %21, %20, %cst_18 {dimension_numbers = #tpu.dot_dimension_numbers<[1], [0], [0], [1], [0, 0, 1, 1], [], []>} : vector<1x32xf32>, vector<32x16xf32>, vector<1x16xf32> -> vector<1x16xf32>
    %24 = vector.broadcast %22 : vector<1x1xf32> to vector<1x16xf32>
    %25 = arith.addf %23, %24 : vector<1x16xf32>
    %c0_19 = arith.constant 0 : index
    %c0_20 = arith.constant 0 : index
    %26 = vector.load %arg10[%c0_19, %c0_20] : memref<1x16xf32, #tpu.memory_space<vmem>>, vector<1x16xf32>
    tpu.vector_store %arg10[%c0_19, %c0_20], %25 {strides = array<i32>} : memref<1x16xf32, #tpu.memory_space<vmem>>, vector<1x16xf32>,
    return
  }
  func.func @transform_0(%arg0: i32) -> (i32, i32) {
    %c0_i32 = arith.constant 0 : i32
    %c0_i32_0 = arith.constant 0 : i32
    return %c0_i32, %arg0 : i32, i32
  }
  func.func @transform_1(%arg0: i32) -> (i32, i32) {
    %c0_i32 = arith.constant 0 : i32
    %c0_i32_0 = arith.constant 0 : i32
    %c0_i32_1 = arith.constant 0 : i32
    return %c0_i32, %c0_i32_0 : i32, i32
  }
  func.func @transform_2(%arg0: i32) -> (i32, i32) {
    %c0_i32 = arith.constant 0 : i32
    %c0_i32_0 = arith.constant 0 : i32
    %c0_i32_1 = arith.constant 0 : i32
    return %c0_i32, %c0_i32_0 : i32, i32
  }
  func.func @transform_3(%arg0: i32) -> (i32, i32) {
    %c0_i32 = arith.constant 0 : i32
    %c0_i32_0 = arith.constant 0 : i32
    %c0_i32_1 = arith.constant 0 : i32
    return %c0_i32, %c0_i32_0 : i32, i32
  }
  func.func @transform_4(%arg0: i32) -> (i32, i32) {
    %c0_i32 = arith.constant 0 : i32
    %c0_i32_0 = arith.constant 0 : i32
    %c0_i32_1 = arith.constant 0 : i32
    return %c0_i32, %c0_i32_0 : i32, i32
  }
  func.func @transform_5(%arg0: i32) -> (i32, i32) {
    %c0_i32 = arith.constant 0 : i32
    %c0_i32_0 = arith.constant 0 : i32
    %c0_i32_1 = arith.constant 0 : i32
    return %c0_i32, %c0_i32_0 : i32, i32
  }
  func.func @transform_6(%arg0: i32) -> (i32, i32) {
    %c0_i32 = arith.constant 0 : i32
    %c0_i32_0 = arith.constant 0 : i32
    %c0_i32_1 = arith.constant 0 : i32
    return %c0_i32, %c0_i32_0 : i32, i32
  }
  func.func @transform_7(%arg0: i32) -> (i32, i32) {
    %c0_i32 = arith.constant 0 : i32
    %c0_i32_0 = arith.constant 0 : i32
    %c0_i32_1 = arith.constant 0 : i32
    return %c0_i32, %c0_i32_0 : i32, i32
  }
  func.func @transform_8(%arg0: i32) -> (i32, i32) {
    %c0_i32 = arith.constant 0 : i32
    %c0_i32_0 = arith.constant 0 : i32
    %c0_i32_1 = arith.constant 0 : i32
    return %c0_i32, %c0_i32_0 : i32, i32
  }
  func.func @transform_9(%arg0: i32) -> (i32, i32) {
    %c0_i32 = arith.constant 0 : i32
    %c0_i32_0 = arith.constant 0 : i32
    return %c0_i32, %arg0 : i32, i32
  }
}

</mosaic_0001>

<bundles_post_ra>
// kernel: tpu_custom_call.1
= control target key start
LH: loop header
LB: loop body
LE: loop exit
PB: predicated region body
PF: predicated region fallthrough
CT: control target
= control target key end

     0   :  { %s513_s0 = inlined_call_operand.vmem [shape: f32[1,16], index: 0, kind: input, shape index: {}]   ;;  %s514_s1 = inlined_call_operand.vmem [shape: f32[32,1], index: 1, kind: input, shape index: {}]   ;;  %s515_s2 = inlined_call_operand.vmem [shape: f32[32,1], index: 2, kind: input, shape index: {}]   ;;  %s516_s3 = inlined_call_operand.vmem [shape: f32[32,32], index: 3, kind: input, shape index: {}]   ;;  %s517_s4 = inlined_call_operand.vmem [shape: f32[32,1], index: 4, kind: input, shape index: {}]   ;;  %s518_s5 = inlined_call_operand.vmem [shape: f32[32,32], index: 5, kind: input, shape index: {}]   ;;  %s519_s6 = inlined_call_operand.vmem [shape: f32[32,1], index: 6, kind: input, shape index: {}]   ;;  %s520_s7 = inlined_call_operand.vmem [shape: f32[1,32], index: 7, kind: input, shape index: {}]   ;;  %s521_s8 = inlined_call_operand.<no memory space> [shape: f32[1,1], index: 8, kind: input, shape index: {}]   ;;  %s522_s9 = inlined_call_operand.hbm [shape: f32[1,16], index: 9, kind: output, shape index: {}]  }
   0x1   :  { %v14_v0 = vstv %s521_s8 }
   0x2   :  { %15 = vst [vmem:[#allocation2] sm:$0x1] %v14_v0 }
   0x3   :  { %v43_v1 = vld [vmem:[%s515_s2 + $0x18] sm:$0xff]  ;;  %v42_v2 = vld [vmem:[%s515_s2 + $0x10] sm:$0xff]  ;;  %v368_v4 = vmov 0  }
   0x4   :  { %v39_v3 = vld [vmem:[%s514_s1 + $0x18] sm:$0xff]  ;;  %316 = vset.pattern.permute.xlu2 %v368_v4  ;;  %315 = vset.pattern.permute.xlu1 %v368_v4 }
   0x5   :  { %314 = vset.pattern.permute.xlu0 %v368_v4  ;;  %88 = vperm.xlu1 %315, %v43_v1  }
   0x6   :  { %83 = vperm.xlu2 %316, %v42_v2   ;;  %61 = vperm.xlu0 %314, %v39_v3  }
   0x7   :  { %16 = vsyncpa [#allocation4], 0  ;;  %v37_v5 = vld [vmem:[%s514_s1 + $0x8] sm:$0xff]  ;;  %v38_v6 = vld [vmem:[%s514_s1 + $0x10] sm:$0xff]  ;;  %vm127_vm0 = vcmask 261120   ;;  %s369_s11 = smov [#allocation3]  }
   0x8   :  { %v36_v7 = vld [vmem:[%s514_s1] sm:$0xff]  ;;  %v41_v9 = vld [vmem:[%s515_s2 + $0x8] sm:$0xff]  ;;  %v106_v10 = vld [vmem:[%s517_s4 + $0x18] sm:$0xff]  ;;  %s286_s14 = sshll.u32 %s522_s9, 4  ;;  %vm277_vm1 = vcmask 122880   ;;  %s287_s14 = int_to_ptr.hbm [resolvable:$true] %s286_s14 }
   0x9   :  { %v40_v8 = vld [vmem:[%s515_s2] sm:$0xff]  ;;  %v104_v11 = vld [vmem:[%s517_s4 + $0x8] sm:$0xff]  ;;  %v105_v12 = vld [vmem:[%s517_s4 + $0x10] sm:$0xff]  ;;  %s284_s2 = sshll.u32 %s369_s11, 4  ;;  %s285_s2 = int_to_ptr.vmem [resolvable:$true] %s284_s2 }
   0xa   :  { %v103_v13 = vld [vmem:[%s517_s4] sm:$0xff]  ;;  %v179_v14 = vld [vmem:[%s519_s6 + $0x10] sm:$0xff]  ;;  %v180_v15 = vld [vmem:[%s519_s6 + $0x18] sm:$0xff] }
   0xb   :  { %v178_v16 = vld [vmem:[%s519_s6 + $0x8] sm:$0xff]  ;;  %v247_v17 = vld [vmem:[#allocation2] sm:$0x1]  ;;  %v101_v42 = vld [vmem:[%s516_s3 + $0x10] sm:$0xff] }
   0xc   :  { %v177_v18 = vld [vmem:[%s519_s6] sm:$0xff]  ;;  %v100_v40 = vld [vmem:[%s516_s3 + $0x8] sm:$0xff]  ;;  %v102_v43 = vld [vmem:[%s516_s3 + $0x18] sm:$0xff] }
   0xd   :  { %51 = vperm.xlu1 %315, %v37_v5   ;;  %v317_v19 = vld [vmem:[%s513_s0] ss:$0 sm:$0xff]  ;;  %v174_v60 = vld [vmem:[%s518_s5 + $0x8] sm:$0xff]  ;;  %v175_v62 = vld [vmem:[%s518_s5 + $0x10] sm:$0xff] }
   0xe   :  { %56 = vperm.xlu0 %314, %v38_v6   ;;  %46 = vperm.xlu2 %316, %v36_v7   ;;  %v99_v39 = vld [vmem:[%s516_s3] sm:$0xff]  ;;  %v176_v63 = vld [vmem:[%s518_s5 + $0x18] sm:$0xff] }
   0xf   :  { %v173_v59 = vld [vmem:[%s518_s5] sm:$0xff] }
  0x15   :  { %73 = vperm.xlu1 %315, %v40_v8  }
  0x16   :  { %78 = vperm.xlu0 %314, %v41_v9   ;;  %124 = vperm.xlu2 %316, %v106_v10  }
  0x1d   :  { %114 = vperm.xlu1 %315, %v104_v11  }
  0x1e   :  { %119 = vperm.xlu0 %314, %v105_v12   ;;  %109 = vperm.xlu2 %316, %v103_v13  }
  0x25   :  { %193 = vperm.xlu1 %315, %v179_v14  }
  0x26   :  { %198 = vperm.xlu0 %314, %v180_v15   ;;  %188 = vperm.xlu2 %316, %v178_v16   ;;  %v246_v15 = vld [vmem:[%s520_s7] sm:$0x1] }
  0x2d   :  { %250 = vperm.xlu1 %315, %v247_v17  }
  0x2e   :  { %183 = vperm.xlu0 %314, %v177_v18  }
  0x60   :  { %v84_v24 = vpop.permute.xlu2 %83 }
  0x68   :  { %v47_v30 = vpop.permute.xlu2 %46 }
  0x69   :  { %v67_v31 = vmul.f32 %v317_v19, %v47_v30 }
  0x70   :  { %v125_v46 = vpop.permute.xlu2 %124 }
  0x77   :  { %v89_v20 = vpop.permute.xlu1 %88 }
  0x78   :  { %v62_v21 = vpop.permute.xlu0 %61  ;;  %v110_v54 = vpop.permute.xlu2 %109 }
  0x79   :  { %v70_v22 = vmul.f32 %v317_v19, %v62_v21 }
  0x7b   :  { %v94_v23 = vadd.f32 %v89_v20, %v70_v22 }
  0x7d   :  { %318 = vtanh.f32 %v94_v23 }
  0x7f   :  { %v52_v25 = vpop.permute.xlu1 %51 }
  0x80   :  { %v57_v26 = vpop.permute.xlu0 %56  ;;  %v68_v32 = vmul.f32 %v317_v19, %v52_v25  ;;  %v189_v7 = vpop.permute.xlu2 %188 }
  0x81   :  { %v69_v27 = vmul.f32 %v317_v19, %v57_v26 }
  0x83   :  { %v319_v28 = vpop.eup %318  ;;  %v93_v29 = vadd.f32 %v84_v24, %v69_v27 }
  0x84   :  { %152 = vmatpush.msra.mxu0 %v319_v28  ;;  %304 = vmatpush.msra.mxu3 %v319_v28 }
  0x85   :  { %320 = vtanh.f32 %v93_v29 }
  0x87   :  { %v74_v33 = vpop.permute.xlu1 %73 }
  0x88   :  { %v79_v34 = vpop.permute.xlu0 %78  ;;  %v91_v36 = vadd.f32 %v74_v33, %v67_v31 }
  0x89   :  { %v92_v35 = vadd.f32 %v79_v34, %v68_v32 }
  0x8b   :  { %v321_v37 = vpop.eup %320  ;;  %322 = vtanh.f32 %v92_v35 }
  0x8c   :  { %153 = vmatpush.msra.mxu0 %v321_v37  ;;  %305 = vmatpush.msra.mxu3 %v321_v37  ;;  %324 = vtanh.f32 %v91_v36 }
  0x8f   :  { %v115_v51 = vpop.permute.xlu1 %114 }
  0x90   :  { %v120_v47 = vpop.permute.xlu0 %119 }
  0x91   :  { %v323_v38 = vpop.eup %322 }
  0x92   :  { %154 = vmatpush.msra.mxu0 %v323_v38  ;;  %306 = vmatpush.msra.mxu3 %v323_v38  ;;  %v325_v41 = vpop.eup %324 }
  0x94   :  { %155 = vmatpush.msra.mxu0 %v325_v41  ;;  %307 = vmatpush.msra.mxu3 %v325_v41 }
  0x95   :  { %295 = vmatmul.msk.f32.vlgmr.msra.gmra.mxu0 %vm127_vm0, %v99_v39  ;;  %296 = vmatmul.msk.f32.vlgmr.msra.gmra.mxu3 %vm127_vm0, %v100_v40 }
  0x97   :  { %v194_v3 = vpop.permute.xlu1 %193 }
  0x98   :  { %v199_v2 = vpop.permute.xlu0 %198 }
  0x9d   :  { %297 = vmatmul.msk.f32.gmra.mxu3 %vm127_vm0, %v101_v42 }
  0x9f   :  { %v251_v17 = vpop.permute.xlu1 %250 }
  0xa0   :  { %v184_v10 = vpop.permute.xlu0 %183  ;;  %v253_v18 = vperm.slane %v251_v17, 0 }
  0xa5   :  { %298 = vmatmul.msk.f32.gmra.mxu3 %vm127_vm0, %v102_v43 }
 0x112   :  { %v157_v52 = vpop.f32.mrf.mxu0 }
 0x113   :  { %v158_v55 = vadd.f32 %v157_v52, %v110_v54 }
 0x118   :  { %v160_v44 = vpop.f32.mrf.mxu3 }
 0x119   :  { %v161_v53 = vadd.f32 %v160_v44, %v115_v51 }
 0x120   :  { %v163_v45 = vpop.f32.mrf.mxu3 }
 0x121   :  { %v164_v49 = vadd.f32 %v163_v45, %v120_v47 }
 0x128   :  { %v166_v48 = vpop.f32.mrf.mxu3 }
 0x129   :  { %v167_v50 = vadd.f32 %v166_v48, %v125_v46 }
 0x12b   :  { %326 = vtanh.f32 %v167_v50 }
 0x12c   :  { %328 = vtanh.f32 %v164_v49 }
 0x12d   :  { %330 = vtanh.f32 %v161_v53 }
 0x12e   :  { %332 = vtanh.f32 %v158_v55 }
 0x131   :  { %v327_v56 = vpop.eup %326 }
 0x132   :  { %225 = vmatpush.msrb.mxu0 %v327_v56  ;;  %308 = vmatpush.msra.mxu1 %v327_v56  ;;  %v329_v57 = vpop.eup %328 }
 0x133   :  { %v331_v58 = vpop.eup %330 }
 0x134   :  { %226 = vmatpush.msrb.mxu0 %v329_v57  ;;  %309 = vmatpush.msra.mxu1 %v329_v57  ;;  %v333_v61 = vpop.eup %332 }
 0x136   :  { %227 = vmatpush.msrb.mxu0 %v331_v58  ;;  %310 = vmatpush.msra.mxu1 %v331_v58 }
 0x138   :  { %228 = vmatpush.msrb.mxu0 %v333_v61  ;;  %311 = vmatpush.msra.mxu1 %v333_v61 }
 0x139   :  { %299 = vmatmul.msk.f32.vlgmr.msrb.gmra.mxu0 %vm127_vm0, %v173_v59  ;;  %300 = vmatmul.msk.f32.vlgmr.msra.gmra.mxu1 %vm127_vm0, %v174_v60 }
 0x141   :  { %301 = vmatmul.msk.f32.gmra.mxu1 %vm127_vm0, %v175_v62 }
 0x149   :  { %302 = vmatmul.msk.f32.gmra.mxu1 %vm127_vm0, %v176_v63 }
 0x1b6   :  { %v233_v0 = vpop.f32.mrf.mxu1  ;;  %v230_v8 = vpop.f32.mrf.mxu0 }
 0x1b7   :  { %v234_v9 = vadd.f32 %v233_v0, %v189_v7  ;;  %v231_v11 = vadd.f32 %v230_v8, %v184_v10 }
 0x1be   :  { %v236_v1 = vpop.f32.mrf.mxu1 }
 0x1bf   :  { %v237_v5 = vadd.f32 %v236_v1, %v194_v3 }
 0x1c6   :  { %v239_v4 = vpop.f32.mrf.mxu1 }
 0x1c7   :  { %v240_v6 = vadd.f32 %v239_v4, %v199_v2 }
 0x1c9   :  { %334 = vtanh.f32 %v240_v6 }
 0x1ca   :  { %336 = vtanh.f32 %v237_v5 }
 0x1cb   :  { %338 = vtanh.f32 %v234_v9 }
 0x1cc   :  { %340 = vtanh.f32 %v231_v11 }
 0x1cf   :  { %v335_v12 = vpop.eup %334 }
 0x1d0   :  { %269 = vmatpush.msra.mxu2 %v335_v12  ;;  %v337_v13 = vpop.eup %336 }
 0x1d1   :  { %v339_v14 = vpop.eup %338 }
 0x1d2   :  { %270 = vmatpush.msra.mxu2 %v337_v13  ;;  %v341_v16 = vpop.eup %340 }
 0x1d4   :  { %271 = vmatpush.msra.mxu2 %v339_v14 }
 0x1d6   :  { %272 = vmatpush.msra.mxu2 %v341_v16 }
 0x1d7   :  { %303 = vmatmul.msk.f32.vlgmr.msra.gmra.mxu2 %vm127_vm0, %v246_v15 }
 0x25a   :  { %v274_v19 = vpop.f32.mrf.mxu2 }
 0x25b   :  { %v275_v20 = vadd.f32 %v274_v19, %v253_v18 }
 0x25d   :  { %278 = vst.msk [vmem:[#allocation3] sm:$0x1] %vm277_vm1, %v275_v20 }
 0x25e   :  { %289 = dma.vmem_to_hbm [thread:$0]  %s285_s2, 16, %s287_s14, [#allocation4]  }
 0x25f   :  { %366 = dma.done.wait [#allocation4], 16  }
 0x260   :  { %367 = vsyncadd [#allocation4], 4294967280 }
 0x261   :  { %294 = vsyncpa [#allocation4], 1 }

</bundles_post_ra>
